<compile_context>
chip_gen: v7x
topology: tpu7x:2x2x1
jax: 0.10.0
libtpu: 0.0.40
codegen_flags: <defaults>
</compile_context>

<pallas_src>
import functools
from math import comb

import numpy as np
import jax
import jax.numpy as jnp
from jax.experimental import pallas as pl
from jax.experimental.pallas import tpu as pltpu


# ----------------------------------------------------------------------------
# sym20 wavelet basis construction (replaces pywt.Wavelet('sym20').wavefun(10)
# + scipy interp1d).  Spectral factorization of the Daubechies half-band
# polynomial, choosing the root set with the most nearly linear phase
# (least-asymmetric = symlet).
# TODO(synk): matches pywt's hardcoded sym20 table only up to the usual sign /
#             time-reversal convention and numerical factorization error; the
#             cascade + np.interp pipeline is likewise approximate, not bit-exact.
# ----------------------------------------------------------------------------
def _sym_rec_filters(N):
    P = np.array([comb(N - 1 + k, k) for k in range(N)], dtype=np.float64)
    y_roots = np.roots(P[::-1])                       # degree N-1

    groups = []
    used = [False] * len(y_roots)
    for i, y in enumerate(y_roots):
        if used[i]:
            continue
        used[i] = True
        b = 2.0 - 4.0 * y
        disc = np.sqrt(b * b - 4.0 + 0j)
        z1, z2 = (b + disc) / 2.0, (b - disc) / 2.0
        z_in = z1 if abs(z1) <= 1.0 else z2
        if abs(y.imag) <= 1e-8 * max(1.0, abs(y.real)):
            groups.append(np.array([complex(z_in.real)]))
        else:
            j = min((k for k in range(len(y_roots)) if not used[k]),
                    key=lambda k: abs(y_roots[k] - np.conj(y)))
            used[j] = True
            groups.append(np.array([z_in, np.conj(z_in)]))

    w = np.linspace(1e-3, np.pi - 1e-3, 512)
    zw = np.exp(1j * w)
    A = np.stack([w, np.ones_like(w)], axis=1)
    pinvA = np.linalg.pinv(A)

    best_score, best_roots = np.inf, None
    for sel in range(1 << len(groups)):
        zr = np.concatenate([(1.0 / g) if (sel >> gi) & 1 else g
                             for gi, g in enumerate(groups)])
        ph = np.unwrap(np.angle(np.prod(zw[:, None] - zr[None, :], axis=1)))
        resid = ph - A @ (pinvA @ ph)
        score = float(resid @ resid)
        if score < best_score:
            best_score, best_roots = score, zr

    roots = np.concatenate([np.full(N, -1.0 + 0j), best_roots])
    h = np.real(np.poly(roots))
    rec_lo = h * (np.sqrt(2.0) / h.sum())
    L = len(rec_lo)
    rec_hi = np.array([(-1.0) ** k * rec_lo[L - 1 - k] for k in range(L)])
    return rec_lo, rec_hi


def _wavefun(rec_lo, rec_hi, level=10):
    def upcoef(first_filter, steps):
        a = np.array([1.0])
        filt = first_filter
        for _ in range(steps):
            up = np.zeros(2 * len(a))
            up[::2] = a
            a = np.convolve(up, filt)
            filt = rec_lo
        return a

    phi = (np.sqrt(2.0) ** level) * upcoef(rec_lo, level)
    psi = (np.sqrt(2.0) ** level) * upcoef(rec_hi, level)
    x = np.linspace(0.0, float(len(rec_lo) - 1), len(phi))
    return phi, psi, x


def make_wavelet_basis(basis_dim):
    rec_lo, rec_hi = _sym_rec_filters(20)            # sym20: 40-tap filters
    phi, psi, x = _wavefun(rec_lo, rec_hi, level=10)
    new_x = np.linspace(x.min(), x.max(), basis_dim)
    new_phi = np.interp(new_x, x, phi)
    new_psi = np.interp(new_x, x, psi)
    W = np.zeros((basis_dim, basis_dim), dtype=np.float32)
    for i in range(basis_dim):
        if i < basis_dim // 2:
            W[:, i] = np.roll(new_phi, i)[:basis_dim]
        else:
            W[:, i] = np.roll(new_psi, i - basis_dim // 2)[:basis_dim]
    return jnp.asarray(W, dtype=jnp.float32)


# ----------------------------------------------------------------------------
# Pallas kernel: 4 x (Linear + ReLU) -> fused head matmul producing the packed
# [backcast | forecast] slab.  All lane dims are multiples of 128 when pack>=4.
# ----------------------------------------------------------------------------
def symlet20_wavelet_kernel(
    x_ref,
    w1_ref, b1_ref, w2_ref, b2_ref, w3_ref, b3_ref, w4_ref, b4_ref,
    wh_ref, bh_ref,
    out_ref,
):
    f32 = jnp.float32

    def fc(a, w_ref, b_ref):
        # MXU operands in the weight dtype (f32 or bf16); accumulate + bias in f32.
        y = jnp.dot(a.astype(w_ref.dtype), w_ref[...], preferred_element_type=f32)
        return y + b_ref[...].astype(f32)

    h = jnp.maximum(fc(x_ref[...], w1_ref, b1_ref), 0.0)
    h = jnp.maximum(fc(h, w2_ref, b2_ref), 0.0)
    h = jnp.maximum(fc(h, w3_ref, b3_ref), 0.0)
    h = jnp.maximum(fc(h, w4_ref, b4_ref), 0.0)

    # Single lane-dense store of the packed [backcast | forecast] slab.
    out_ref[...] = fc(h, wh_ref, bh_ref).astype(out_ref.dtype)


# ----------------------------------------------------------------------------
# Fold + lane-pack the parameters.
# ----------------------------------------------------------------------------
def _block_diag(w, p):
    if p == 1:
        return w
    k, n = w.shape
    eye = jnp.eye(p, dtype=w.dtype)
    return (eye[:, None, :, None] * w[None, :, None, :]).reshape(p * k, p * n)


def _tile_bias(b, p):
    return b if p == 1 else jnp.tile(b, (1, p))


def fold_and_pack(params, *, pack, weight_dtype=jnp.float32):
    """Fold basis + down-sample into the heads, then build pack-row block-diagonal
    weights and lane-tiled biases.  Differentiable; call once (hoisted) for
    inference, or inside the training step when params change."""
    basis = params["basis"]
    wb_eff = params["wb"] @ basis @ params["wbd"]     # (units, backcast)
    wf_eff = params["wf"] @ basis @ params["wfd"]     # (units, forecast)
    bb_eff = params["bb"] @ basis @ params["wbd"]     # (1, backcast)
    bf_eff = params["bf"] @ basis @ params["wfd"]     # (1, forecast)
    wh = jnp.concatenate([wb_eff, wf_eff], axis=1)    # (units, H)
    bh = jnp.concatenate([bb_eff, bf_eff], axis=1)    # (1, H)

    weights = [params["w1"], params["w2"], params["w3"], params["w4"], wh]
    biases = [params["b1"], params["b2"], params["b3"], params["b4"], bh]
    # Quantize (optionally) AFTER the fold; biases / accumulation stay f32.
    weights = tuple(_block_diag(w, pack).astype(weight_dtype) for w in weights)
    biases = tuple(_tile_bias(b, pack).astype(jnp.float32) for b in biases)
    return weights, biases


# ----------------------------------------------------------------------------
# Batch-tile selection.
# ----------------------------------------------------------------------------
def _num_tensorcores():
    # v7x has 2 TensorCores per chip; v5e/v6e have 1.  Fall back to 1 when the
    # runtime does not expose a core count (grid=(1,) is the right default on
    # single-TC chips for this overhead-bound kernel).
    try:
        n = int(getattr(jax.devices()[0], "num_cores", 1))
        return max(1, n)
    except Exception:
        return 1


def _pick_batch_tile(bp, max_tile=4096):
    nc = _num_tensorcores()
    target = bp // 2 if (nc >= 2 and bp % 2 == 0) else bp
    if target <= max_tile and (target == bp or target % 8 == 0):
        return target
    best = None
    t = 8
    while t <= min(bp, max_tile):
        if bp % t == 0:
            best = t
        t += 8
    return best if best is not None else bp


# ----------------------------------------------------------------------------
# Forward wrappers.
# ----------------------------------------------------------------------------
@functools.partial(
    jax.jit,
    static_argnames=("backcast_length", "forecast_length", "batch_tile",
                     "out_dtype", "return_fused"),
)
def symlet20_wavelet_forward_prefolded(x, weights, biases, *, backcast_length,
                                       forecast_length, batch_tile=None,
                                       out_dtype=jnp.float32, return_fused=False):
    """Forward pass given pre-folded / pre-packed weights (inference fast path)."""
    B, L = x.shape
    assert L == backcast_length
    H = backcast_length + forecast_length

    Kp = weights[0].shape[0]            # pack * backcast_length
    pack = Kp // backcast_length
    assert pack * backcast_length == Kp and B % pack == 0
    Hp = weights[4].shape[1]            # pack * H
    Bp = B // pack

    x_packed = x.reshape(Bp, Kp)        # contiguous row-major reshape (free)

    bm = _pick_batch_tile(Bp) if batch_tile is None else batch_tile
    assert Bp % bm == 0
    grid = (Bp // bm,)

    args = [x_packed]
    for w, b in zip(weights, biases):
        args.extend((w, b))

    in_specs = [pl.BlockSpec((bm, Kp), lambda i: (i, 0))]
    # Grid-invariant weights / biases (constant index maps).
    # TODO(synk): if units/basis_dim grow to O(1000), add
    #             pipeline_mode=pl.Buffered(1) here to single-buffer the constants.
    in_specs += [pl.BlockSpec(a.shape, lambda i: (0, 0)) for a in args[1:]]

    out = pl.pallas_call(
        symlet20_wavelet_kernel,
        out_shape=jax.ShapeDtypeStruct((Bp, Hp), out_dtype),
        grid_spec=pltpu.PrefetchScalarGridSpec(
            num_scalar_prefetch=0,
            grid=grid,
            in_specs=in_specs,
            out_specs=pl.BlockSpec((bm, Hp), lambda i: (i, 0)),
        ),
        compiler_params=pltpu.CompilerParams(
            # Shards the batch axis across TensorCores on dual-TC chips; no-op on
            # single-TC v5e/v6e.
            dimension_semantics=("parallel",),
        ),
    )(*args)

    out = out.reshape(B, H)             # free row-major un-packing
    if return_fused:
        return out                      # fused [backcast | forecast] slab
    return out[:, :backcast_length], out[:, backcast_length:]


@functools.partial(
    jax.jit,
    static_argnames=("backcast_length", "forecast_length", "pack", "batch_tile",
                     "use_bf16", "out_dtype", "return_fused"),
)
def symlet20_wavelet_forward(x, params, *, backcast_length, forecast_length,
                             pack=4, batch_tile=None, use_bf16=False,
                             out_dtype=jnp.float32, return_fused=False):
    """Training-safe entry: folds + packs the raw params every call.
    pack=4 is portable; pack=8 better fills the 256-wide MXU on v6e/v7x."""
    B, L = x.shape
    assert L == backcast_length

    p = int(pack)
    while p > 1 and B % p != 0:         # largest pack factor that divides B
        p -= 1

    wdtype = jnp.bfloat16 if use_bf16 else jnp.float32
    weights, biases = fold_and_pack(params, pack=p, weight_dtype=wdtype)
    # NOTE: x is NOT cast to bf16 here; the kernel casts the VMEM tile in-place,
    # avoiding an extra wrapper-side HBM pass over x.
    return symlet20_wavelet_forward_prefolded(
        x, weights, biases,
        backcast_length=backcast_length, forecast_length=forecast_length,
        batch_tile=batch_tile, out_dtype=out_dtype, return_fused=return_fused)


# ----------------------------------------------------------------------------
# Deterministic parameter initialization (shapes as in the PyTorch __init__,
# Linear weights stored pre-transposed as (in_features, out_features)).
# ----------------------------------------------------------------------------
def init_params(key, units, backcast_length, forecast_length, basis_dim):
    def linear(k, fan_in, fan_out, bias=True):
        kw, kb = jax.random.split(k)
        bound = 1.0 / np.sqrt(fan_in)
        W = jax.random.uniform(kw, (fan_in, fan_out), jnp.float32, -bound, bound)
        b = (jax.random.uniform(kb, (1, fan_out), jnp.float32, -bound, bound)
             if bias else None)
        return W, b

    ks = jax.random.split(key, 8)
    w1, b1 = linear(ks[0], backcast_length, units)
    w2, b2 = linear(ks[1], units, units)
    w3, b3 = linear(ks[2], units, units)
    w4, b4 = linear(ks[3], units, units)
    wb, bb = linear(ks[4], units, basis_dim)                         # backcast_linear
    wf, bf = linear(ks[5], units, basis_dim)                         # forecast_linear
    wbd, _ = linear(ks[6], basis_dim, backcast_length, bias=False)   # backcast_down_sample
    wfd, _ = linear(ks[7], basis_dim, forecast_length, bias=False)   # forecast_down_sample

    basis = make_wavelet_basis(basis_dim)   # frozen sym20 basis (shared by both heads)
    return dict(
        w1=w1, b1=b1, w2=w2, b2=b2, w3=w3, b3=b3, w4=w4, b4=b4,
        wb=wb, bb=bb, wf=wf, bf=bf, basis=basis, wbd=wbd, wfd=wfd,
    )


def ref_forward(x, p):
    """Unfused pure-JAX reference matching the original module's op order."""
    h = x
    for W, b in ((p["w1"], p["b1"]), (p["w2"], p["b2"]),
                 (p["w3"], p["b3"]), (p["w4"], p["b4"])):
        h = jnp.maximum(h @ W + b, 0.0)
    tb = h @ p["wb"] + p["bb"]
    tf = h @ p["wf"] + p["bf"]
    b_out = (tb @ p["basis"]) @ p["wbd"]
    f_out = (tf @ p["basis"]) @ p["wfd"]
    return b_out, f_out


if __name__ == "__main__":
    batch = 64
    backcast_length = 24
    forecast_length = 8
    units = 32
    basis_dim = 32

    key = jax.random.PRNGKey(0)
    kx, kp = jax.random.split(key)
    x = jax.random.normal(kx, (batch, backcast_length), dtype=jnp.float32)
    params = init_params(kp, units, backcast_length, forecast_length, basis_dim)
    b_ref, f_ref = ref_forward(x, params)

    # f32 path (training-safe entry, fold+pack inside jit): parity with reference.
    b_out, f_out = symlet20_wavelet_forward(
        x, params,
        backcast_length=backcast_length, forecast_length=forecast_length,
        pack=4, use_bf16=False)
    jax.block_until_ready((b_out, f_out))
    np.testing.assert_allclose(np.asarray(b_out), np.asarray(b_ref), rtol=1e-3, atol=1e-3)
    np.testing.assert_allclose(np.asarray(f_out), np.asarray(f_ref), rtol=1e-3, atol=1e-3)
    assert b_out.shape == (batch, backcast_length)
    assert f_out.shape == (batch, forecast_length)

    # Inference fast path: fold/pack hoisted out of the per-call jit, bf16 MXU
    # operands + bf16 output slab (loose check against the f32 reference).
    w_bf16, b_bf16 = fold_and_pack(params, pack=4, weight_dtype=jnp.bfloat16)
    b16, f16 = symlet20_wavelet_forward_prefolded(
        x, w_bf16, b_bf16,
        backcast_length=backcast_length, forecast_length=forecast_length,
        out_dtype=jnp.bfloat16)
    jax.block_until_ready((b16, f16))
    assert float(jnp.max(jnp.abs(b16.astype(jnp.float32) - b_ref))) < 0.25
    assert float(jnp.max(jnp.abs(f16.astype(jnp.float32) - f_ref))) < 0.25

    print("KERNEL_OK")
</pallas_src>

<mosaic_0001>
module attributes {stable_mosaic.version = 11 : i64} {
  func.func @symlet20_wavelet_kernel(%arg0: i32, %arg1: memref<16x96xf32, #tpu.memory_space<vmem>>, %arg2: memref<96x128xf32, #tpu.memory_space<vmem>>, %arg3: memref<1x128xf32, #tpu.memory_space<vmem>>, %arg4: memref<128x128xf32, #tpu.memory_space<vmem>>, %arg5: memref<1x128xf32, #tpu.memory_space<vmem>>, %arg6: memref<128x128xf32, #tpu.memory_space<vmem>>, %arg7: memref<1x128xf32, #tpu.memory_space<vmem>>, %arg8: memref<128x128xf32, #tpu.memory_space<vmem>>, %arg9: memref<1x128xf32, #tpu.memory_space<vmem>>, %arg10: memref<128x128xf32, #tpu.memory_space<vmem>>, %arg11: memref<1x128xf32, #tpu.memory_space<vmem>>, %arg12: memref<16x128xf32, #tpu.memory_space<vmem>>) attributes {dimension_semantics = [#tpu.dimension_semantics<parallel>], iteration_bounds = array<i64: 1>, scalar_prefetch = 0 : i64, scratch_operands = 0 : i64, tpu.core_type = #tpu.core_type<tc>, window_params = [{transform_indices = @transform_0, window_bounds = array<i64: 16, 96>}, {pipeline_mode = #tpu.pipeline_mode<synchronous>, transform_indices = @transform_1, window_bounds = array<i64: 96, 128>}, {pipeline_mode = #tpu.pipeline_mode<synchronous>, transform_indices = @transform_2, window_bounds = array<i64: 1, 128>}, {pipeline_mode = #tpu.pipeline_mode<synchronous>, transform_indices = @transform_3, window_bounds = array<i64: 128, 128>}, {pipeline_mode = #tpu.pipeline_mode<synchronous>, transform_indices = @transform_4, window_bounds = array<i64: 1, 128>}, {pipeline_mode = #tpu.pipeline_mode<synchronous>, transform_indices = @transform_5, window_bounds = array<i64: 128, 128>}, {pipeline_mode = #tpu.pipeline_mode<synchronous>, transform_indices = @transform_6, window_bounds = array<i64: 1, 128>}, {pipeline_mode = #tpu.pipeline_mode<synchronous>, transform_indices = @transform_7, window_bounds = array<i64: 128, 128>}, {pipeline_mode = #tpu.pipeline_mode<synchronous>, transform_indices = @transform_8, window_bounds = array<i64: 1, 128>}, {pipeline_mode = #tpu.pipeline_mode<synchronous>, transform_indices = @transform_9, window_bounds = array<i64: 128, 128>}, {pipeline_mode = #tpu.pipeline_mode<synchronous>, transform_indices = @transform_10, window_bounds = array<i64: 1, 128>}, {transform_indices = @transform_11, window_bounds = array<i64: 16, 128>}]} {
    %c0 = arith.constant 0 : index
    %c0_0 = arith.constant 0 : index
    %0 = vector.load %arg1[%c0, %c0_0] : memref<16x96xf32, #tpu.memory_space<vmem>>, vector<16x96xf32>
    %c0_1 = arith.constant 0 : index
    %c0_2 = arith.constant 0 : index
    %1 = vector.load %arg2[%c0_1, %c0_2] : memref<96x128xf32, #tpu.memory_space<vmem>>, vector<96x128xf32>
    %cst = arith.constant dense<0.000000e+00> : vector<16x128xf32>
    %2 = tpu.matmul %0, %1, %cst {dimension_numbers = #tpu.dot_dimension_numbers<[1], [0], [0], [1], [0, 0, 1, 1], [], []>} : vector<16x96xf32>, vector<96x128xf32>, vector<16x128xf32> -> vector<16x128xf32>
    %c0_3 = arith.constant 0 : index
    %c0_4 = arith.constant 0 : index
    %3 = vector.load %arg3[%c0_3, %c0_4] : memref<1x128xf32, #tpu.memory_space<vmem>>, vector<1x128xf32>
    %4 = vector.broadcast %3 : vector<1x128xf32> to vector<16x128xf32>
    %5 = arith.addf %2, %4 : vector<16x128xf32>
    %cst_5 = arith.constant 0.000000e+00 : f32
    %6 = vector.broadcast %cst_5 : f32 to vector<16x128xf32>
    %7 = arith.maximumf %5, %6 : vector<16x128xf32>
    %c0_6 = arith.constant 0 : index
    %c0_7 = arith.constant 0 : index
    %8 = vector.load %arg4[%c0_6, %c0_7] : memref<128x128xf32, #tpu.memory_space<vmem>>, vector<128x128xf32>
    %cst_8 = arith.constant dense<0.000000e+00> : vector<16x128xf32>
    %9 = tpu.matmul %7, %8, %cst_8 {dimension_numbers = #tpu.dot_dimension_numbers<[1], [0], [0], [1], [0, 0, 1, 1], [], []>} : vector<16x128xf32>, vector<128x128xf32>, vector<16x128xf32> -> vector<16x128xf32>
    %c0_9 = arith.constant 0 : index
    %c0_10 = arith.constant 0 : index
    %10 = vector.load %arg5[%c0_9, %c0_10] : memref<1x128xf32, #tpu.memory_space<vmem>>, vector<1x128xf32>
    %11 = vector.broadcast %10 : vector<1x128xf32> to vector<16x128xf32>
    %12 = arith.addf %9, %11 : vector<16x128xf32>
    %cst_11 = arith.constant 0.000000e+00 : f32
    %13 = vector.broadcast %cst_11 : f32 to vector<16x128xf32>
    %14 = arith.maximumf %12, %13 : vector<16x128xf32>
    %c0_12 = arith.constant 0 : index
    %c0_13 = arith.constant 0 : index
    %15 = vector.load %arg6[%c0_12, %c0_13] : memref<128x128xf32, #tpu.memory_space<vmem>>, vector<128x128xf32>
    %cst_14 = arith.constant dense<0.000000e+00> : vector<16x128xf32>
    %16 = tpu.matmul %14, %15, %cst_14 {dimension_numbers = #tpu.dot_dimension_numbers<[1], [0], [0], [1], [0, 0, 1, 1], [], []>} : vector<16x128xf32>, vector<128x128xf32>, vector<16x128xf32> -> vector<16x128xf32>
    %c0_15 = arith.constant 0 : index
    %c0_16 = arith.constant 0 : index
    %17 = vector.load %arg7[%c0_15, %c0_16] : memref<1x128xf32, #tpu.memory_space<vmem>>, vector<1x128xf32>
    %18 = vector.broadcast %17 : vector<1x128xf32> to vector<16x128xf32>
    %19 = arith.addf %16, %18 : vector<16x128xf32>
    %cst_17 = arith.constant 0.000000e+00 : f32
    %20 = vector.broadcast %cst_17 : f32 to vector<16x128xf32>
    %21 = arith.maximumf %19, %20 : vector<16x128xf32>
    %c0_18 = arith.constant 0 : index
    %c0_19 = arith.constant 0 : index
    %22 = vector.load %arg8[%c0_18, %c0_19] : memref<128x128xf32, #tpu.memory_space<vmem>>, vector<128x128xf32>
    %cst_20 = arith.constant dense<0.000000e+00> : vector<16x128xf32>
    %23 = tpu.matmul %21, %22, %cst_20 {dimension_numbers = #tpu.dot_dimension_numbers<[1], [0], [0], [1], [0, 0, 1, 1], [], []>} : vector<16x128xf32>, vector<128x128xf32>, vector<16x128xf32> -> vector<16x128xf32>
    %c0_21 = arith.constant 0 : index
    %c0_22 = arith.constant 0 : index
    %24 = vector.load %arg9[%c0_21, %c0_22] : memref<1x128xf32, #tpu.memory_space<vmem>>, vector<1x128xf32>
    %25 = vector.broadcast %24 : vector<1x128xf32> to vector<16x128xf32>
    %26 = arith.addf %23, %25 : vector<16x128xf32>
    %cst_23 = arith.constant 0.000000e+00 : f32
    %27 = vector.broadcast %cst_23 : f32 to vector<16x128xf32>
    %28 = arith.maximumf %26, %27 : vector<16x128xf32>
    %c0_24 = arith.constant 0 : index
    %c0_25 = arith.constant 0 : index
    %29 = vector.load %arg10[%c0_24, %c0_25] : memref<128x128xf32, #tpu.memory_space<vmem>>, vector<128x128xf32>
    %cst_26 = arith.constant dense<0.000000e+00> : vector<16x128xf32>
    %30 = tpu.matmul %28, %29, %cst_26 {dimension_numbers = #tpu.dot_dimension_numbers<[1], [0], [0], [1], [0, 0, 1, 1], [], []>} : vector<16x128xf32>, vector<128x128xf32>, vector<16x128xf32> -> vector<16x128xf32>
    %c0_27 = arith.constant 0 : index
    %c0_28 = arith.constant 0 : index
    %31 = vector.load %arg11[%c0_27, %c0_28] : memref<1x128xf32, #tpu.memory_space<vmem>>, vector<1x128xf32>
    %32 = vector.broadcast %31 : vector<1x128xf32> to vector<16x128xf32>
    %33 = arith.addf %30, %32 : vector<16x128xf32>
    %c0_29 = arith.constant 0 : index
    %c0_30 = arith.constant 0 : index
    %34 = vector.load %arg12[%c0_29, %c0_30] : memref<16x128xf32, #tpu.memory_space<vmem>>, vector<16x128xf32>
    tpu.vector_store %arg12[%c0_29, %c0_30], %33 {strides = array<i32>} : memref<16x128xf32, #tpu.memory_space<vmem>>, vector<16x128xf32>,
    return
  }
  func.func @transform_0(%arg0: i32) -> (i32, i32) {
    %c0_i32 = arith.constant 0 : i32
    %c0_i32_0 = arith.constant 0 : i32
    return %arg0, %c0_i32 : i32, i32
  }
  func.func @transform_1(%arg0: i32) -> (i32, i32) {
    %c0_i32 = arith.constant 0 : i32
    %c0_i32_0 = arith.constant 0 : i32
    %c0_i32_1 = arith.constant 0 : i32
    return %c0_i32, %c0_i32_0 : i32, i32
  }
  func.func @transform_2(%arg0: i32) -> (i32, i32) {
    %c0_i32 = arith.constant 0 : i32
    %c0_i32_0 = arith.constant 0 : i32
    %c0_i32_1 = arith.constant 0 : i32
    return %c0_i32, %c0_i32_0 : i32, i32
  }
  func.func @transform_3(%arg0: i32) -> (i32, i32) {
    %c0_i32 = arith.constant 0 : i32
    %c0_i32_0 = arith.constant 0 : i32
    %c0_i32_1 = arith.constant 0 : i32
    return %c0_i32, %c0_i32_0 : i32, i32
  }
  func.func @transform_4(%arg0: i32) -> (i32, i32) {
    %c0_i32 = arith.constant 0 : i32
    %c0_i32_0 = arith.constant 0 : i32
    %c0_i32_1 = arith.constant 0 : i32
    return %c0_i32, %c0_i32_0 : i32, i32
  }
  func.func @transform_5(%arg0: i32) -> (i32, i32) {
    %c0_i32 = arith.constant 0 : i32
    %c0_i32_0 = arith.constant 0 : i32
    %c0_i32_1 = arith.constant 0 : i32
    return %c0_i32, %c0_i32_0 : i32, i32
  }
  func.func @transform_6(%arg0: i32) -> (i32, i32) {
    %c0_i32 = arith.constant 0 : i32
    %c0_i32_0 = arith.constant 0 : i32
    %c0_i32_1 = arith.constant 0 : i32
    return %c0_i32, %c0_i32_0 : i32, i32
  }
  func.func @transform_7(%arg0: i32) -> (i32, i32) {
    %c0_i32 = arith.constant 0 : i32
    %c0_i32_0 = arith.constant 0 : i32
    %c0_i32_1 = arith.constant 0 : i32
    return %c0_i32, %c0_i32_0 : i32, i32
  }
  func.func @transform_8(%arg0: i32) -> (i32, i32) {
    %c0_i32 = arith.constant 0 : i32
    %c0_i32_0 = arith.constant 0 : i32
    %c0_i32_1 = arith.constant 0 : i32
    return %c0_i32, %c0_i32_0 : i32, i32
  }
  func.func @transform_9(%arg0: i32) -> (i32, i32) {
    %c0_i32 = arith.constant 0 : i32
    %c0_i32_0 = arith.constant 0 : i32
    %c0_i32_1 = arith.constant 0 : i32
    return %c0_i32, %c0_i32_0 : i32, i32
  }
  func.func @transform_10(%arg0: i32) -> (i32, i32) {
    %c0_i32 = arith.constant 0 : i32
    %c0_i32_0 = arith.constant 0 : i32
    %c0_i32_1 = arith.constant 0 : i32
    return %c0_i32, %c0_i32_0 : i32, i32
  }
  func.func @transform_11(%arg0: i32) -> (i32, i32) {
    %c0_i32 = arith.constant 0 : i32
    %c0_i32_0 = arith.constant 0 : i32
    return %arg0, %c0_i32 : i32, i32
  }
}

</mosaic_0001>

<bundles_post_ra>
// kernel: symlet20_wavelet_forward_prefolded.1
= control target key start
LH: loop header
LB: loop body
LE: loop exit
PB: predicated region body
PF: predicated region fallthrough
CT: control target
= control target key end

     0   :  { %16 = vsyncpa [#allocation3], 0  ;;  %s1334_s0 = inlined_call_operand.vmem [shape: f32[16,96], index: 0, kind: input, shape index: {}]   ;;  %s1335_s1 = inlined_call_operand.hbm [shape: f32[96,128], index: 1, kind: input, shape index: {}]   ;;  %s1336_s2 = inlined_call_operand.vmem [shape: f32[1,128], index: 2, kind: input, shape index: {}]   ;;  %s1337_s3 = inlined_call_operand.vmem [shape: f32[128,128], index: 3, kind: input, shape index: {}]   ;;  %s1338_s4 = inlined_call_operand.vmem [shape: f32[1,128], index: 4, kind: input, shape index: {}]   ;;  %s1339_s5 = inlined_call_operand.hbm [shape: f32[128,128], index: 5, kind: input, shape index: {}]   ;;  %s1340_s6 = inlined_call_operand.vmem [shape: f32[1,128], index: 6, kind: input, shape index: {}]   ;;  %s1341_s7 = inlined_call_operand.hbm [shape: f32[128,128], index: 7, kind: input, shape index: {}]   ;;  %s1342_s8 = inlined_call_operand.vmem [shape: f32[1,128], index: 8, kind: input, shape index: {}]   ;;  %s1343_s9 = inlined_call_operand.hbm [shape: f32[128,128], index: 9, kind: input, shape index: {}]   ;;  %s1344_s10 = inlined_call_operand.vmem [shape: f32[1,128], index: 10, kind: input, shape index: {}]   ;;  %s1345_s11 = inlined_call_operand.vmem [shape: f32[16,128], index: 11, kind: output, shape index: {}]  }
   0x1   :  { %17 = vsyncpa [#allocation5], 0 }
   0x2   :  { %18 = vsyncpa [#allocation8], 0  ;;  %s1117_s17 = smov [#allocation4]   ;;  %s1118_s19 = smov [#allocation2]  }
   0x3   :  { %s44_s18 = sshll.u32 %s1117_s17, 4  ;;  %s26_s20 = sshll.u32 %s1118_s19, 4  ;;  %s45_s18 = int_to_ptr.vmem [resolvable:$true] %s44_s18  ;;  %s1183_s20 = int_to_ptr.vmem [resolvable:$true] %s26_s20 }
   0x4   :  { %s1023_s23 = scalar_lea.hbm %s1339_s5, 2048 }
   0x5   :  { %p1024_p0 = scmp.ne.s32.totalorder %s1339_s5, %s1023_s23  ;;  %p1027_p1 = scmp.lt.u32.totalorder %s1023_s23, %s1339_s5 }
   0x7   :  { %p1029_p2 = pnand %p1027_p1, %p1024_p0 }
   0x9   :  { %1032 = shalt.err (!%p1029_p2)
}
   0xa   :  { %s1033_s28 = scalar_lea.vmem %s45_s18, 2048  ;;  %p1038_p4 = scmp.lt.s32.totalorder %s45_s18, %s45_s18 }
   0xb   :  { %p1034_p3 = scmp.ne.s32.totalorder %s45_s18, %s1033_s28  ;;  %p1039_p5 = scmp.lt.s32.totalorder %s1033_s28, %s1033_s28 }
   0xd   :  { %p1040_p6 = por %p1039_p5, %p1038_p4 }
   0xf   :  { %p1041_p7 = pnand %p1040_p6, %p1034_p3 }
  0x11   :  { %1044 = shalt.err (!%p1041_p7)
}
  0x12   :  { %s1119_s29 = smov 128   ;;  %s1120_s30 = smov 8  }
  0x13   :  { %50 = dma.hbm_to_vmem [thread:$0]  %s1339_s5, 2048, %s45_s18, [#allocation5], %s1119_s29, %s1119_s29, %s1120_s30  }
  0x14   :  { %s1045_s16 = scalar_lea.hbm %s1335_s1, 1536 }
  0x15   :  { %p1046_p8 = scmp.ne.s32.totalorder %s1335_s1, %s1045_s16  ;;  %p1049_p9 = scmp.lt.u32.totalorder %s1045_s16, %s1335_s1 }
  0x17   :  { %p1051_p10 = pnand %p1049_p9, %p1046_p8 }
  0x19   :  { %1054 = shalt.err (!%p1051_p10)
}
  0x1a   :  { %s1055_s23 = scalar_lea.vmem %s1183_s20, 1536  ;;  %p1060_p12 = scmp.lt.s32.totalorder %s1183_s20, %s1183_s20 }
  0x1b   :  { %p1056_p11 = scmp.ne.s32.totalorder %s1183_s20, %s1055_s23  ;;  %p1061_p13 = scmp.lt.s32.totalorder %s1055_s23, %s1055_s23 }
  0x1d   :  { %p1062_p0 = por %p1061_p13, %p1060_p12 }
  0x1f   :  { %p1063_p1 = pnand %p1062_p0, %p1056_p11 }
  0x21   :  { %1066 = shalt.err (!%p1063_p1)
}
  0x22   :  { %32 = dma.hbm_to_vmem [thread:$0]  %s1335_s1, 1536, %s1183_s20, [#allocation3], %s1119_s29, %s1119_s29, %s1120_s30  }
  0x23   :  { %s1121_s24 = smov [#allocation6]   ;;  %s1122_s26 = smov [#allocation7]  }
  0x24   :  { %s58_s25 = sshll.u32 %s1121_s24, 4  ;;  %s72_s27 = sshll.u32 %s1122_s26, 4  ;;  %s59_s25 = int_to_ptr.vmem [resolvable:$true] %s58_s25  ;;  %s1220_s27 = int_to_ptr.vmem [resolvable:$true] %s72_s27 }
  0x25   :  { %s1067_s13 = scalar_lea.hbm %s1341_s7, 2048 }
  0x26   :  { %p1068_p2 = scmp.ne.s32.totalorder %s1341_s7, %s1067_s13  ;;  %p1071_p3 = scmp.lt.u32.totalorder %s1067_s13, %s1341_s7 }
  0x28   :  { %p1073_p4 = pnand %p1071_p3, %p1068_p2 }
  0x2a   :  { %1076 = shalt.err (!%p1073_p4)
}
  0x2b   :  { %s1077_s1 = scalar_lea.vmem %s59_s25, 2048  ;;  %p1082_p6 = scmp.lt.s32.totalorder %s59_s25, %s59_s25 }
  0x2c   :  { %p1078_p5 = scmp.ne.s32.totalorder %s59_s25, %s1077_s1  ;;  %p1083_p7 = scmp.lt.s32.totalorder %s1077_s1, %s1077_s1 }
  0x2e   :  { %p1084_p8 = por %p1083_p7, %p1082_p6 }
  0x30   :  { %p1085_p9 = pnand %p1084_p8, %p1078_p5 }
  0x32   :  { %1088 = shalt.err (!%p1085_p9)
}
  0x33   :  { %64 = dma.hbm_to_vmem [thread:$0]  %s1341_s7, 2048, %s59_s25, [#allocation5], %s1119_s29, %s1119_s29, %s1120_s30  }
  0x34   :  { %s1089_s23 = scalar_lea.hbm %s1343_s9, 2048 }
  0x35   :  { %p1090_p10 = scmp.ne.s32.totalorder %s1343_s9, %s1089_s23  ;;  %p1093_p11 = scmp.lt.u32.totalorder %s1089_s23, %s1343_s9 }
  0x37   :  { %p1095_p12 = pnand %p1093_p11, %p1090_p10 }
  0x39   :  { %1098 = shalt.err (!%p1095_p12)
}
  0x3a   :  { %s1099_s28 = scalar_lea.vmem %s1220_s27, 2048  ;;  %p1104_p0 = scmp.lt.s32.totalorder %s1220_s27, %s1220_s27 }
  0x3b   :  { %p1100_p13 = scmp.ne.s32.totalorder %s1220_s27, %s1099_s28  ;;  %p1105_p1 = scmp.lt.s32.totalorder %s1099_s28, %s1099_s28 }
  0x3d   :  { %p1106_p2 = por %p1105_p1, %p1104_p0 }
  0x3f   :  { %p1107_p3 = pnand %p1106_p2, %p1100_p13 }
  0x41   :  { %1110 = shalt.err (!%p1107_p3)
}
  0x42   :  { %78 = dma.hbm_to_vmem [thread:$0]  %s1343_s9, 2048, %s1220_s27, [#allocation8], %s1119_s29, %s1119_s29, %s1120_s30  }
  0x43   :  { %1111 = dma.done.wait [#allocation3], 1536  }
  0x44   :  { %1112 = vsyncadd [#allocation3], 4294965760 }
  0x45   :  { %1113 = dma.done.wait [#allocation5], 4096  }
  0x46   :  { %1114 = vsyncadd [#allocation5], 4294963200 }
  0x47   :  { %1115 = dma.done.wait [#allocation8], 2048  }
  0x48   :  { %1116 = vsyncadd [#allocation8], 4294965248  ;;  %v95_v0 = vld [vmem:[#allocation2] sm:$0xff]  ;;  %v96_v1 = vld [vmem:[#allocation2 + $0x8] sm:$0xff]  ;;  %vm114_vm0 = vcmask 785408  }
  0x49   :  { %v97_v2 = vld [vmem:[#allocation2 + $0x10] sm:$0xff]  ;;  %v865_v3 = vpack.c.bf16 %v96_v1, %v95_v0  ;;  %v98_v4 = vld [vmem:[#allocation2 + $0x18] sm:$0xff]  ;;  %v99_v6 = vld [vmem:[#allocation2 + $0x20] sm:$0xff] }
  0x4a   :  { %v869_v5 = vpack.c.bf16 %v98_v4, %v97_v2  ;;  %v100_v7 = vld [vmem:[#allocation2 + $0x28] sm:$0xff]  ;;  %v93_v8 = vld [vmem:[%s1334_s0] sm:$0xff]  ;;  %v200_v12 = vld [vmem:[%s1337_s3 + $0x10] sm:$0xff] }
  0x4b   :  { %866 = vmatprep.subr.bf16.mxu0 %v865_v3  ;;  %v198_v9 = vld [vmem:[%s1337_s3] sm:$0xff]  ;;  %v873_v10 = vpack.c.bf16 %v100_v7, %v99_v6  ;;  %722 = vmatprep.mubr.msk.f32.mxu0 %vm114_vm0, %v93_v8  ;;  %v199_v11 = vld [vmem:[%s1337_s3 + $0x8] sm:$0xff]  ;;  %v201_v13 = vld [vmem:[%s1337_s3 + $0x18] sm:$0xff] }
  0x4c   :  { %868 = vmatpush3.bf16.msra.mxu0 %v865_v3  ;;  %v101_v14 = vld [vmem:[#allocation2 + $0x30] sm:$0xff]  ;;  %v102_v15 = vld [vmem:[#allocation2 + $0x38] sm:$0xff]  ;;  %v889_v16 = vpack.c.bf16 %v199_v11, %v198_v9  ;;  %v893_v17 = vpack.c.bf16 %v201_v13, %v200_v12  ;;  %v202_v18 = vld [vmem:[%s1337_s3 + $0x20] sm:$0xff] }
  0x4d   :  { %870 = vmatprep.subr.bf16.mxu0 %v869_v5  ;;  %v203_v19 = vld [vmem:[%s1337_s3 + $0x28] sm:$0xff]  ;;  %v877_v20 = vpack.c.bf16 %v102_v15, %v101_v14  ;;  %v103_v21 = vld [vmem:[#allocation2 + $0x40] sm:$0xff]  ;;  %v204_v24 = vld [vmem:[%s1337_s3 + $0x30] sm:$0xff] }
  0x4e   :  { %890 = vmatprep.subr.bf16.mxu1 %v889_v16  ;;  %v104_v22 = vld [vmem:[#allocation2 + $0x48] sm:$0xff]  ;;  %v897_v23 = vpack.c.bf16 %v203_v19, %v202_v18  ;;  %v205_v25 = vld [vmem:[%s1337_s3 + $0x38] sm:$0xff]  ;;  %v105_v27 = vld [vmem:[#allocation2 + $0x50] sm:$0xff] }
  0x4f   :  { %892 = vmatpush3.bf16.msra.mxu1 %v889_v16  ;;  %v881_v26 = vpack.c.bf16 %v104_v22, %v103_v21  ;;  %v106_v28 = vld [vmem:[#allocation2 + $0x58] sm:$0xff]  ;;  %v901_v29 = vpack.c.bf16 %v205_v25, %v204_v24  ;;  %v206_v30 = vld [vmem:[%s1337_s3 + $0x40] sm:$0xff]  ;;  %v207_v31 = vld [vmem:[%s1337_s3 + $0x48] sm:$0xff] }
  0x50   :  { %872 = vmatpush3.bf16.msra.mxu0 %v869_v5  ;;  %894 = vmatprep.subr.bf16.mxu1 %v893_v17  ;;  %v885_v32 = vpack.c.bf16 %v106_v28, %v105_v27  ;;  %v905_v33 = vpack.c.bf16 %v207_v31, %v206_v30  ;;  %v208_v34 = vld [vmem:[%s1337_s3 + $0x50] sm:$0xff]  ;;  %v209_v35 = vld [vmem:[%s1337_s3 + $0x58] sm:$0xff]  ;;  %v210_v37 = vld [vmem:[%s1337_s3 + $0x60] sm:$0xff] }
  0x51   :  { %874 = vmatprep.subr.bf16.mxu0 %v873_v10  ;;  %v909_v36 = vpack.c.bf16 %v209_v35, %v208_v34  ;;  %v211_v38 = vld [vmem:[%s1337_s3 + $0x68] sm:$0xff]  ;;  %v212_v41 = vld [vmem:[%s1337_s3 + $0x70] sm:$0xff]  ;;  %v213_v42 = vld [vmem:[%s1337_s3 + $0x78] sm:$0xff] }
  0x52   :  { %v94_v39 = vld [vmem:[%s1334_s0 + $0x8] sm:$0xff]  ;;  %v913_v40 = vpack.c.bf16 %v211_v38, %v210_v37  ;;  %v917_v43 = vpack.c.bf16 %v213_v42, %v212_v41  ;;  %v298_v44 = vld [vmem:[#allocation4] sm:$0xff]  ;;  %v300_v46 = vld [vmem:[#allocation4 + $0x10] sm:$0xff] }
  0x53   :  { %896 = vmatpush3.bf16.msra.mxu1 %v893_v17  ;;  %v299_v45 = vld [vmem:[#allocation4 + $0x8] sm:$0xff]  ;;  %v301_v48 = vld [vmem:[#allocation4 + $0x18] sm:$0xff]  ;;  %v302_v50 = vld [vmem:[#allocation4 + $0x20] sm:$0xff] }
  0x54   :  { %876 = vmatpush3.bf16.msra.mxu0 %v873_v10  ;;  %898 = vmatprep.subr.bf16.mxu1 %v897_v23  ;;  %v921_v47 = vpack.c.bf16 %v299_v45, %v298_v44  ;;  %v925_v49 = vpack.c.bf16 %v301_v48, %v300_v46  ;;  %v303_v51 = vld [vmem:[#allocation4 + $0x28] sm:$0xff]  ;;  %v304_v53 = vld [vmem:[#allocation4 + $0x30] sm:$0xff]  ;;  %v305_v54 = vld [vmem:[#allocation4 + $0x38] sm:$0xff] }
  0x55   :  { %878 = vmatprep.subr.bf16.mxu0 %v877_v20  ;;  %v929_v52 = vpack.c.bf16 %v303_v51, %v302_v50  ;;  %v933_v55 = vpack.c.bf16 %v305_v54, %v304_v53  ;;  %v306_v56 = vld [vmem:[#allocation4 + $0x40] sm:$0xff]  ;;  %v307_v57 = vld [vmem:[#allocation4 + $0x48] sm:$0xff]  ;;  %v308_v59 = vld [vmem:[#allocation4 + $0x50] sm:$0xff] }
  0x56   :  { %v937_v58 = vpack.c.bf16 %v307_v57, %v306_v56  ;;  %v309_v60 = vld [vmem:[#allocation4 + $0x58] sm:$0xff]  ;;  %v310_v62 = vld [vmem:[#allocation4 + $0x60] sm:$0xff]  ;;  %v311_v63 = vld [vmem:[#allocation4 + $0x68] sm:$0xff] }
  0x57   :  { %900 = vmatpush3.bf16.msra.mxu1 %v897_v23  ;;  %v941_v61 = vpack.c.bf16 %v309_v60, %v308_v59  ;;  %v945_v0 = vpack.c.bf16 %v311_v63, %v310_v62  ;;  %v605_v1 = vld [vmem:[%s1336_s2] ss:$0 sm:$0xff]  ;;  %v312_v8 = vld [vmem:[#allocation4 + $0x70] sm:$0xff]  ;;  %v313_v9 = vld [vmem:[#allocation4 + $0x78] sm:$0xff] }
  0x58   :  { %880 = vmatpush3.bf16.msra.mxu0 %v877_v20  ;;  %902 = vmatprep.subr.bf16.mxu1 %v901_v29  ;;  %v949_v10 = vpack.c.bf16 %v313_v9, %v312_v8  ;;  %v398_v11 = vld [vmem:[#allocation6] sm:$0xff]  ;;  %v399_v12 = vld [vmem:[#allocation6 + $0x8] sm:$0xff]  ;;  %v400_v13 = vld [vmem:[#allocation6 + $0x10] sm:$0xff] }
  0x59   :  { %882 = vmatprep.subr.bf16.mxu0 %v881_v26  ;;  %v953_v14 = vpack.c.bf16 %v399_v12, %v398_v11  ;;  %v401_v15 = vld [vmem:[#allocation6 + $0x18] sm:$0xff]  ;;  %v402_v17 = vld [vmem:[#allocation6 + $0x20] sm:$0xff]  ;;  %v403_v18 = vld [vmem:[#allocation6 + $0x28] sm:$0xff] }
  0x5a   :  { %v957_v16 = vpack.c.bf16 %v401_v15, %v400_v13  ;;  %v961_v19 = vpack.c.bf16 %v403_v18, %v402_v17  ;;  %v404_v20 = vld [vmem:[#allocation6 + $0x30] sm:$0xff]  ;;  %v405_v21 = vld [vmem:[#allocation6 + $0x38] sm:$0xff]  ;;  %v406_v23 = vld [vmem:[#allocation6 + $0x40] sm:$0xff] }
  0x5b   :  { %904 = vmatpush3.bf16.msra.mxu1 %v901_v29  ;;  %v965_v22 = vpack.c.bf16 %v405_v21, %v404_v20  ;;  %v407_v24 = vld [vmem:[#allocation6 + $0x48] sm:$0xff]  ;;  %v409_v27 = vld [vmem:[#allocation6 + $0x58] sm:$0xff]  ;;  %v410_v29 = vld [vmem:[#allocation6 + $0x60] sm:$0xff] }
  0x5c   :  { %884 = vmatpush3.bf16.msra.mxu0 %v881_v26  ;;  %906 = vmatprep.subr.bf16.mxu1 %v905_v33  ;;  %v969_v25 = vpack.c.bf16 %v407_v24, %v406_v23  ;;  %v408_v26 = vld [vmem:[#allocation6 + $0x50] sm:$0xff]  ;;  %v411_v30 = vld [vmem:[#allocation6 + $0x68] sm:$0xff]  ;;  %v498_v42 = vld [vmem:[#allocation7] sm:$0xff] }
  0x5d   :  { %886 = vmatprep.subr.bf16.mxu0 %v885_v32  ;;  %v973_v28 = vpack.c.bf16 %v409_v27, %v408_v26  ;;  %v977_v31 = vpack.c.bf16 %v411_v30, %v410_v29  ;;  %v500_v44 = vld [vmem:[#allocation7 + $0x10] sm:$0xff]  ;;  %v501_v46 = vld [vmem:[#allocation7 + $0x18] sm:$0xff]  ;;  %v502_v48 = vld [vmem:[#allocation7 + $0x20] sm:$0xff] }
  0x5e   :  { %v504_v51 = vld [vmem:[#allocation7 + $0x30] sm:$0xff]  ;;  %v506_v54 = vld [vmem:[#allocation7 + $0x40] sm:$0xff] }
  0x5f   :  { %908 = vmatpush3.bf16.msra.mxu1 %v905_v33  ;;  %v508_v57 = vld [vmem:[#allocation7 + $0x50] sm:$0xff]  ;;  %v510_v60 = vld [vmem:[#allocation7 + $0x60] sm:$0xff] }
  0x60   :  { %888 = vmatpush3.bf16.msra.mxu0 %v885_v32  ;;  %910 = vmatprep.subr.bf16.mxu1 %v909_v36  ;;  %v608_v32 = vld [vmem:[%s1338_s4] ss:$0 sm:$0xff] }
  0x61   :  { %922 = vmatprep.subr.bf16.mxu0 %v921_v47  ;;  %v609_v63 = vld [vmem:[%s1340_s6] ss:$0 sm:$0xff] }
  0x62   :  { %v610_v9 = vld [vmem:[%s1342_s8] ss:$0 sm:$0xff] }
  0x63   :  { %723 = vmatmul.mubr.msk.f32.vlgmr.msra.gmra.mrb[0].mxu0 %vm114_vm0, %v94_v39  ;;  %912 = vmatpush3.bf16.msra.mxu1 %v909_v36  ;;  %v412_v39 = vld [vmem:[#allocation6 + $0x70] sm:$0xff] }
  0x64   :  { %914 = vmatprep.subr.bf16.mxu1 %v913_v40  ;;  %924 = vmatpush3.bf16.msra.mxu0 %v921_v47  ;;  %v989_v47 = vpack.c.bf16 %v501_v46, %v500_v44 }
  0x65   :  { %926 = vmatprep.subr.bf16.mxu0 %v925_v49 }
  0x67   :  { %916 = vmatpush3.bf16.msra.mxu1 %v913_v40  ;;  %v413_v40 = vld [vmem:[#allocation6 + $0x78] sm:$0xff] }
  0x68   :  { %918 = vmatprep.subr.bf16.mxu1 %v917_v43  ;;  %928 = vmatpush3.bf16.msra.mxu0 %v925_v49  ;;  %v981_v41 = vpack.c.bf16 %v413_v40, %v412_v39  ;;  %v503_v49 = vld [vmem:[#allocation7 + $0x28] sm:$0xff] }
  0x69   :  { %930 = vmatprep.subr.bf16.mxu0 %v929_v52  ;;  %v993_v50 = vpack.c.bf16 %v503_v49, %v502_v48 }
  0x6b   :  { %920 = vmatpush3.bf16.msra.mxu1 %v917_v43  ;;  %v499_v43 = vld [vmem:[#allocation7 + $0x8] sm:$0xff] }
  0x6c   :  { %932 = vmatpush3.bf16.msra.mxu0 %v929_v52  ;;  %954 = vmatprep.subr.bf16.mxu1 %v953_v14  ;;  %v985_v45 = vpack.c.bf16 %v499_v43, %v498_v42  ;;  %v505_v52 = vld [vmem:[#allocation7 + $0x38] sm:$0xff] }
  0x6d   :  { %934 = vmatprep.subr.bf16.mxu0 %v933_v55  ;;  %v997_v53 = vpack.c.bf16 %v505_v52, %v504_v51 }
  0x70   :  { %936 = vmatpush3.bf16.msra.mxu0 %v933_v55  ;;  %v507_v55 = vld [vmem:[#allocation7 + $0x48] sm:$0xff] }
  0x71   :  { %938 = vmatprep.subr.bf16.mxu0 %v937_v58  ;;  %v1001_v56 = vpack.c.bf16 %v507_v55, %v506_v54 }
  0x74   :  { %940 = vmatpush3.bf16.msra.mxu0 %v937_v58  ;;  %v509_v58 = vld [vmem:[#allocation7 + $0x58] sm:$0xff] }
  0x75   :  { %942 = vmatprep.subr.bf16.mxu0 %v941_v61  ;;  %v1005_v59 = vpack.c.bf16 %v509_v58, %v508_v57 }
  0x78   :  { %944 = vmatpush3.bf16.msra.mxu0 %v941_v61  ;;  %v511_v61 = vld [vmem:[#allocation7 + $0x68] sm:$0xff] }
  0x79   :  { %946 = vmatprep.subr.bf16.mxu0 %v945_v0  ;;  %v1009_v62 = vpack.c.bf16 %v511_v61, %v510_v60 }
  0x7c   :  { %948 = vmatpush3.bf16.msra.mxu0 %v945_v0 }
  0x7d   :  { %950 = vmatprep.subr.bf16.mxu0 %v949_v10 }
  0x80   :  { %952 = vmatpush3.bf16.msra.mxu0 %v949_v10 }
  0x81   :  { %986 = vmatprep.subr.bf16.mxu0 %v985_v45 }
 0x136   :  { %v724_v2 = vpop.f32.mrb[0].mxu0 }
 0x137   :  { %v193_v3 = vadd.f32 %v724_v2, %v605_v1  ;;  %v187_v4 = vpop.f32.mrb[1].mxu0 }
 0x138   :  { %v188_v5 = vadd.f32 %v605_v1, %v187_v4 }
 0x139   :  { %v197_v7 = vmax.f32 %v193_v3, 0.0 }
 0x13a   :  { %v196_v6 = vmax.f32 %v188_v5, 0.0 }
 0x13c   :  { %757 = vmatprep.mubr.f32.mxu1 %v196_v6  ;;  %v512_v6 = vld [vmem:[#allocation7 + $0x70] sm:$0xff] }
 0x13d   :  { %758 = vmatmul.mubr.f32.vlgmr.msra.gmra.mrb[0].mxu1 %v197_v7  ;;  %v513_v7 = vld [vmem:[#allocation7 + $0x78] sm:$0xff] }
 0x13e   :  { %956 = vmatpush3.bf16.msra.mxu1 %v953_v14  ;;  %v1013_v8 = vpack.c.bf16 %v513_v7, %v512_v6 }
 0x13f   :  { %958 = vmatprep.subr.bf16.mxu1 %v957_v16 }
 0x142   :  { %960 = vmatpush3.bf16.msra.mxu1 %v957_v16  ;;  %v611_v16 = vld [vmem:[%s1344_s10] ss:$0 sm:$0xff] }
 0x143   :  { %962 = vmatprep.subr.bf16.mxu1 %v961_v19 }
 0x146   :  { %964 = vmatpush3.bf16.msra.mxu1 %v961_v19 }
 0x147   :  { %966 = vmatprep.subr.bf16.mxu1 %v965_v22 }
 0x14a   :  { %968 = vmatpush3.bf16.msra.mxu1 %v965_v22 }
 0x14b   :  { %970 = vmatprep.subr.bf16.mxu1 %v969_v25 }
 0x14e   :  { %972 = vmatpush3.bf16.msra.mxu1 %v969_v25 }
 0x14f   :  { %974 = vmatprep.subr.bf16.mxu1 %v973_v28 }
 0x152   :  { %976 = vmatpush3.bf16.msra.mxu1 %v973_v28 }
 0x153   :  { %978 = vmatprep.subr.bf16.mxu1 %v977_v31 }
 0x156   :  { %980 = vmatpush3.bf16.msra.mxu1 %v977_v31 }
 0x157   :  { %982 = vmatprep.subr.bf16.mxu1 %v981_v41 }
 0x15a   :  { %984 = vmatpush3.bf16.msra.mxu1 %v981_v41 }
 0x210   :  { %v759_v33 = vpop.f32.mrb[0].mxu1 }
 0x211   :  { %v293_v34 = vadd.f32 %v759_v33, %v608_v32  ;;  %v287_v35 = vpop.f32.mrb[1].mxu1 }
 0x212   :  { %v288_v36 = vadd.f32 %v608_v32, %v287_v35 }
 0x213   :  { %v297_v38 = vmax.f32 %v293_v34, 0.0 }
 0x214   :  { %v296_v37 = vmax.f32 %v288_v36, 0.0 }
 0x216   :  { %792 = vmatprep.mubr.f32.mxu0 %v296_v37 }
 0x217   :  { %793 = vmatmul.mubr.f32.vlgmr.msra.gmra.mrb[2].mxu0 %v297_v38 }
 0x218   :  { %988 = vmatpush3.bf16.msra.mxu0 %v985_v45 }
 0x219   :  { %990 = vmatprep.subr.bf16.mxu0 %v989_v47 }
 0x21c   :  { %992 = vmatpush3.bf16.msra.mxu0 %v989_v47 }
 0x21d   :  { %994 = vmatprep.subr.bf16.mxu0 %v993_v50 }
 0x220   :  { %996 = vmatpush3.bf16.msra.mxu0 %v993_v50 }
 0x221   :  { %998 = vmatprep.subr.bf16.mxu0 %v997_v53 }
 0x224   :  { %1000 = vmatpush3.bf16.msra.mxu0 %v997_v53 }
 0x225   :  { %1002 = vmatprep.subr.bf16.mxu0 %v1001_v56 }
 0x228   :  { %1004 = vmatpush3.bf16.msra.mxu0 %v1001_v56 }
 0x229   :  { %1006 = vmatprep.subr.bf16.mxu0 %v1005_v59 }
 0x22c   :  { %1008 = vmatpush3.bf16.msra.mxu0 %v1005_v59 }
 0x22d   :  { %1010 = vmatprep.subr.bf16.mxu0 %v1009_v62 }
 0x230   :  { %1012 = vmatpush3.bf16.msra.mxu0 %v1009_v62 }
 0x231   :  { %1014 = vmatprep.subr.bf16.mxu0 %v1013_v8 }
 0x234   :  { %1016 = vmatpush3.bf16.msra.mxu0 %v1013_v8 }
 0x2ea   :  { %v794_v0 = vpop.f32.mrb[2].mxu0 }
 0x2eb   :  { %v393_v1 = vadd.f32 %v794_v0, %v609_v63  ;;  %v387_v2 = vpop.f32.mrb[3].mxu0 }
 0x2ec   :  { %v388_v3 = vadd.f32 %v609_v63, %v387_v2 }
 0x2ed   :  { %v397_v5 = vmax.f32 %v393_v1, 0.0 }
 0x2ee   :  { %v396_v4 = vmax.f32 %v388_v3, 0.0 }
 0x2f0   :  { %827 = vmatprep.mubr.f32.mxu1 %v396_v4 }
 0x2f1   :  { %828 = vmatmul.mubr.f32.vlgmr.msra.gmra.mrb[2].mxu1 %v397_v5 }
 0x3c4   :  { %v829_v10 = vpop.f32.mrb[2].mxu1 }
 0x3c5   :  { %v493_v11 = vadd.f32 %v829_v10, %v610_v9  ;;  %v487_v12 = vpop.f32.mrb[3].mxu1 }
 0x3c6   :  { %v488_v13 = vadd.f32 %v610_v9, %v487_v12 }
 0x3c7   :  { %v497_v15 = vmax.f32 %v493_v11, 0.0 }
 0x3c8   :  { %v496_v14 = vmax.f32 %v488_v13, 0.0 }
 0x3ca   :  { %862 = vmatprep.mubr.f32.mxu0 %v496_v14 }
 0x3cb   :  { %863 = vmatmul.mubr.f32.vlgmr.msra.gmra.mrb[4].mxu0 %v497_v15 }
 0x49e   :  { %v864_v17 = vpop.f32.mrb[4].mxu0 }
 0x49f   :  { %v593_v18 = vadd.f32 %v864_v17, %v611_v16  ;;  %v587_v19 = vpop.f32.mrb[5].mxu0 }
 0x4a0   :  { %v588_v20 = vadd.f32 %v611_v16, %v587_v19 }
 0x4a1   :  { %597 = vst [vmem:[%s1345_s11 + $0x8] sm:$0xff] %v593_v18 }
 0x4a2   :  { %596 = vst [vmem:[%s1345_s11] sm:$0xff] %v588_v20 }
 0x4a3   :  { %602 = vsyncpa [#allocation3], 1 }
 0x4a4   :  { %603 = vsyncpa [#allocation5], 1 }
 0x4a5   :  { %604 = vsyncpa [#allocation8], 1 }

</bundles_post_ra>
